<compile_context>
chip_gen: v6e
topology: v6e:2x2x1
jax: 0.10.0
libtpu: 0.0.40
codegen_flags: <defaults>
</compile_context>

<pallas_src>
import functools
import math

import jax
import jax.numpy as jnp
from jax.experimental import pallas as pl
from jax.experimental.pallas import tpu as pltpu

_I32_MIN = -(2 ** 31)  # knockout sentinel in key space


def _float_key(xf):
    """Order-preserving signed-int32 key of an f32 array."""
    bits = pltpu.bitcast(xf, jnp.int32)
    return jnp.where(bits < 0, bits ^ 0x7FFFFFFF, bits)


def _key_to_float(key):
    """Exact inverse of _float_key."""
    bits = jnp.where(key < 0, key ^ 0x7FFFFFFF, key)
    return pltpu.bitcast(bits, jnp.float32)


def _kmax_kernel(x_ref, o_ref, *, k: int, transpose_in: bool, pack_index: bool):
    """x_ref: (R_TILE, L) if transpose_in else (L, R_TILE); o_ref: (k, R_TILE).

    Keeps the k largest values along the L axis of every column, in their
    original order (lowest index wins ties).
    """
    xw = x_ref[...]
    is_int = jnp.issubdtype(xw.dtype, jnp.integer)
    # Widen once to a 32-bit type (int32 keys are exact for <=32-bit signed
    # ints, f32 is exact for bf16/f16/f32); no sub-32-bit arithmetic anywhere.
    xw = xw.astype(jnp.int32) if is_int else xw.astype(jnp.float32)
    if transpose_in:
        # dim == last axis: tile-local VMEM transpose (XLU) instead of a full
        # HBM transpose in the wrapper.
        xw = xw.T
    L, rt = xw.shape

    vkey = xw if is_int else _float_key(xw)
    # Larger rev == earlier row.
    rev_iota = (L - 1) - jax.lax.broadcasted_iota(jnp.int32, (L, rt), 0)

    if pack_index:
        # bf16: value bits in the high 16, row id in the low 16 -> one reduce
        # per pass selects value AND index; keys are unique per element.
        key = (vkey & -65536) | rev_iota
    else:
        key = vkey

    vals, revs = [], []
    for _ in range(k):
        m = jnp.max(key, axis=0, keepdims=True)                  # (1, rt)
        if pack_index:
            rev = m & 0xFFFF
            key = jnp.where(key == m, _I32_MIN, key)             # exactly one hit
            vk = m & -65536
            vk = jnp.where(vk < 0, vk | 0xFFFF, vk)              # restore masked low bits
        else:
            cand = jnp.where(key == m, rev_iota, -1)
            rev = jnp.max(cand, axis=0, keepdims=True)           # lowest index wins ties
            key = jnp.where(rev_iota == rev, _I32_MIN, key)      # knock out that row only
            vk = m
        val = vk.astype(o_ref.dtype) if is_int else _key_to_float(vk).astype(o_ref.dtype)
        vals.append(val)
        revs.append(rev)

    # Restore original order: sort the k (val, rev) rows by descending rev
    # (ascending original index) with an O(k^2) compare/swap network.
    for i in range(k):
        for j in range(k - 1 - i):
            swap = revs[j] < revs[j + 1]
            revs[j], revs[j + 1] = (jnp.where(swap, revs[j + 1], revs[j]),
                                    jnp.where(swap, revs[j], revs[j + 1]))
            vals[j], vals[j + 1] = (jnp.where(swap, vals[j + 1], vals[j]),
                                    jnp.where(swap, vals[j], vals[j + 1]))

    # Lane-dense single-sublane stores straight into the output block.
    for j in range(k):
        o_ref[pl.ds(j, 1), :] = vals[j]


def _vmem_capacity_bytes() -> int:
    try:
        return int(getattr(pltpu.get_tpu_info(), "vmem_capacity_bytes", 64 << 20))
    except Exception:  # unknown runtime / interpreter
        return 64 << 20


def _choose_r_tile(R: int, L: int, itemsize: int) -> int:
    """Lane-tile over R: as big as the VMEM budget allows (no artificial cap),
    while keeping >=4 grid steps when possible (v7x runs 2 TensorCores)."""
    if R <= 256:
        return R
    big_vmem = _vmem_capacity_bytes() >= (96 << 20)          # v5e / v6e: 128 MiB
    budget = (4 << 20) if big_vmem else (2 << 20)            # per-block budget
    # double-buffered input block + ~2 live 32-bit temporaries per element
    per_lane = L * (2 * max(itemsize, 4) + 8)
    tile = budget // max(per_lane, 1)
    tile = min(tile, max(512, (R // 4 // 128) * 128))        # >=4 steps if tiles stay >=512
    tile = max(128, min(tile, R))
    return (tile // 128) * 128


def k_max_pooling(x, k: int, dim: int, *, r_tile: int | None = None):
    """Pallas implementation of K_MaxPooling(k)(x, dim)."""
    ndim = x.ndim
    dim = dim % ndim
    L = x.shape[dim]
    if not 1 <= k <= L:
        raise ValueError(f"k={k} must be in [1, {L}] for dim {dim}")
    dtype = x.dtype
    pack_index = (dtype == jnp.bfloat16) and L <= (1 << 16)

    # Fused path: pool over the last axis (TextRCNN) with no HBM transpose of
    # the input; the kernel transposes each tile in VMEM instead.
    fused = (dim == ndim - 1) and (L % 8 == 0)
    if fused:
        keep_shape = x.shape[:-1]
        R = math.prod(keep_shape) if keep_shape else 1
        x2d = x.reshape(R, L)                                 # pure metadata
    else:
        x_m = x if dim == 0 else jnp.moveaxis(x, dim, 0)      # unavoidable for middle dims
        keep_shape = x_m.shape[1:]
        R = math.prod(keep_shape) if keep_shape else 1
        x2d = x_m.reshape(L, R)

    if r_tile is None:
        r_tile = _choose_r_tile(R, L, dtype.itemsize)
    r_tile = max(1, min(int(r_tile), R))
    grid = (pl.cdiv(R, r_tile),)

    if fused:
        in_spec = pl.BlockSpec((r_tile, L), lambda i: (i, 0))
    else:
        in_spec = pl.BlockSpec((L, r_tile), lambda i: (0, i))
    out_spec = pl.BlockSpec((k, r_tile), lambda i: (0, i))

    vmem_limit = (64 << 20) if _vmem_capacity_bytes() >= (96 << 20) else (32 << 20)
    cost = pl.CostEstimate(
        flops=(3 if pack_index else 5) * k * R * L,
        transcendentals=0,
        bytes_accessed=(L + k) * R * dtype.itemsize,
    )

    out2d = pl.pallas_call(
        functools.partial(_kmax_kernel, k=k, transpose_in=fused, pack_index=pack_index),
        out_shape=jax.ShapeDtypeStruct((k, R), dtype),
        grid=grid,
        in_specs=[in_spec],
        out_specs=out_spec,
        compiler_params=pltpu.CompilerParams(
            dimension_semantics=("parallel",),
            vmem_limit_bytes=vmem_limit,
        ),
        cost_estimate=cost,
    )(x2d)

    out = out2d.reshape((k,) + keep_shape)
    if fused:
        return jnp.moveaxis(out, 0, ndim - 1)                 # only the small output moves
    return out if dim == 0 else jnp.moveaxis(out, 0, dim)


def _reference(x, k, dim):
    # Pure-JAX reference mirroring the torch code.
    xm = jnp.moveaxis(x, dim, -1)
    _, idx = jax.lax.top_k(xm, k)
    idx = jnp.sort(idx, axis=-1)
    out = jnp.take_along_axis(xm, idx, axis=-1)
    return jnp.moveaxis(out, -1, dim)


if __name__ == "__main__":
    key = jax.random.PRNGKey(0)
    k1, k2, k3, k4, k5 = jax.random.split(key, 5)

    # 1) TextRCNN call pattern: (batch, channels, seq), pool over the last axis
    #    -> fused path, no HBM transpose of the input.
    x1 = jax.random.normal(k1, (2, 4, 16), dtype=jnp.float32)
    out1 = jax.block_until_ready(k_max_pooling(x1, k=3, dim=2))
    assert out1.shape == (2, 4, 3), out1.shape
    assert jnp.allclose(out1, _reference(x1, 3, 2))

    # 2) 4-D input, pool over a middle axis; force a multi-block pipelined grid.
    x2 = jax.random.normal(k2, (2, 4, 16, 16), dtype=jnp.float32)
    out2 = jax.block_until_ready(k_max_pooling(x2, k=2, dim=1, r_tile=128))
    assert out2.shape == (2, 2, 16, 16), out2.shape
    assert jnp.allclose(out2, _reference(x2, 2, 1))

    # 3) bf16 path: packed 16-bit-value + index key, single reduce per pass.
    base = (jnp.arange(2 * 4 * 16, dtype=jnp.float32) - 60.0) / 8.0
    x3 = jax.random.permutation(k3, base).reshape(2, 4, 16).astype(jnp.bfloat16)
    out3 = jax.block_until_ready(k_max_pooling(x3, k=3, dim=-1))
    assert out3.shape == (2, 4, 3), out3.shape
    assert jnp.array_equal(out3, _reference(x3, 3, -1))

    # 4) columns where k exceeds the number of finite values (-inf handling fix).
    x4 = jax.random.normal(k4, (2, 4, 8), dtype=jnp.float32)
    x4 = x4.at[0, 0, 1:].set(-jnp.inf)
    x4 = x4.at[1, 2, :].set(-jnp.inf)
    out4 = jax.block_until_ready(k_max_pooling(x4, k=3, dim=-1))
    assert out4.shape == (2, 4, 3), out4.shape
    assert jnp.array_equal(out4, _reference(x4, 3, -1))

    # 5) pooling over the leading axis (no transposes anywhere).
    x5 = jax.random.normal(k5, (16, 2, 4), dtype=jnp.float32)
    out5 = jax.block_until_ready(k_max_pooling(x5, k=2, dim=0))
    assert out5.shape == (2, 2, 4), out5.shape
    assert jnp.allclose(out5, _reference(x5, 2, 0))

    print("KERNEL_OK")
</pallas_src>

<mosaic_0001>
module attributes {stable_mosaic.version = 11 : i64} {
  func.func @_kmax_kernel(%arg0: i32, %arg1: memref<8x16xf32, #tpu.memory_space<vmem>>, %arg2: memref<3x8xf32, #tpu.memory_space<vmem>>) attributes {dimension_semantics = [#tpu.dimension_semantics<parallel>], iteration_bounds = array<i64: 1>, scalar_prefetch = 0 : i64, scratch_operands = 0 : i64, tpu.core_type = #tpu.core_type<tc>, window_params = [{transform_indices = @transform_0, window_bounds = array<i64: 8, 16>}, {transform_indices = @transform_1, window_bounds = array<i64: 3, 8>}]} {
    %c0 = arith.constant 0 : index
    %c0_0 = arith.constant 0 : index
    %0 = vector.load %arg1[%c0, %c0_0] : memref<8x16xf32, #tpu.memory_space<vmem>>, vector<8x16xf32>
    %1 = tpu.transpose %0, [1, 0] : vector<8x16xf32> -> vector<16x8xf32>
    %2 = tpu.bitcast %1 : vector<16x8xf32> -> vector<16x8xi32>
    %c0_i32 = arith.constant 0 : i32
    %3 = vector.broadcast %c0_i32 : i32 to vector<16x8xi32>
    %4 = arith.cmpi slt, %2, %3 : vector<16x8xi32>
    %c2147483647_i32 = arith.constant 2147483647 : i32
    %5 = vector.broadcast %c2147483647_i32 : i32 to vector<16x8xi32>
    %6 = arith.xori %2, %5 : vector<16x8xi32>
    %7 = arith.select %4, %6, %2 : vector<16x8xi1>, vector<16x8xi32>
    %8 = tpu.iota {dimensions = array<i32: 0>} : vector<16x8xi32>
    %c15_i32 = arith.constant 15 : i32
    %9 = vector.broadcast %c15_i32 : i32 to vector<16x8xi32>
    %10 = arith.subi %9, %8 : vector<16x8xi32>
    %cst = arith.constant dense<-2147483648> : vector<8xi32>
    %11 = vector.multi_reduction <maxsi>, %7, %cst [0] : vector<16x8xi32> to vector<8xi32>
    %12 = vector.shape_cast %11 : vector<8xi32> to vector<1x8xi32>
    %13 = vector.broadcast %12 : vector<1x8xi32> to vector<16x8xi32>
    %14 = arith.cmpi eq, %7, %13 : vector<16x8xi32>
    %c-1_i32 = arith.constant -1 : i32
    %15 = vector.broadcast %c-1_i32 : i32 to vector<16x8xi32>
    %16 = arith.select %14, %10, %15 : vector<16x8xi1>, vector<16x8xi32>
    %cst_1 = arith.constant dense<-2147483648> : vector<8xi32>
    %17 = vector.multi_reduction <maxsi>, %16, %cst_1 [0] : vector<16x8xi32> to vector<8xi32>
    %18 = vector.shape_cast %17 : vector<8xi32> to vector<1x8xi32>
    %19 = vector.broadcast %18 : vector<1x8xi32> to vector<16x8xi32>
    %20 = arith.cmpi eq, %10, %19 : vector<16x8xi32>
    %c-2147483648_i32 = arith.constant -2147483648 : i32
    %21 = vector.broadcast %c-2147483648_i32 : i32 to vector<16x8xi32>
    %22 = arith.select %20, %21, %7 : vector<16x8xi1>, vector<16x8xi32>
    %c0_i32_2 = arith.constant 0 : i32
    %23 = vector.broadcast %c0_i32_2 : i32 to vector<1x8xi32>
    %24 = arith.cmpi slt, %12, %23 : vector<1x8xi32>
    %c2147483647_i32_3 = arith.constant 2147483647 : i32
    %25 = vector.broadcast %c2147483647_i32_3 : i32 to vector<1x8xi32>
    %26 = arith.xori %12, %25 : vector<1x8xi32>
    %27 = arith.select %24, %26, %12 : vector<1x8xi1>, vector<1x8xi32>
    %28 = tpu.bitcast %27 : vector<1x8xi32> -> vector<1x8xf32>
    %cst_4 = arith.constant dense<-2147483648> : vector<8xi32>
    %29 = vector.multi_reduction <maxsi>, %22, %cst_4 [0] : vector<16x8xi32> to vector<8xi32>
    %30 = vector.shape_cast %29 : vector<8xi32> to vector<1x8xi32>
    %31 = vector.broadcast %30 : vector<1x8xi32> to vector<16x8xi32>
    %32 = arith.cmpi eq, %22, %31 : vector<16x8xi32>
    %c-1_i32_5 = arith.constant -1 : i32
    %33 = vector.broadcast %c-1_i32_5 : i32 to vector<16x8xi32>
    %34 = arith.select %32, %10, %33 : vector<16x8xi1>, vector<16x8xi32>
    %cst_6 = arith.constant dense<-2147483648> : vector<8xi32>
    %35 = vector.multi_reduction <maxsi>, %34, %cst_6 [0] : vector<16x8xi32> to vector<8xi32>
    %36 = vector.shape_cast %35 : vector<8xi32> to vector<1x8xi32>
    %37 = vector.broadcast %36 : vector<1x8xi32> to vector<16x8xi32>
    %38 = arith.cmpi eq, %10, %37 : vector<16x8xi32>
    %c-2147483648_i32_7 = arith.constant -2147483648 : i32
    %39 = vector.broadcast %c-2147483648_i32_7 : i32 to vector<16x8xi32>
    %40 = arith.select %38, %39, %22 : vector<16x8xi1>, vector<16x8xi32>
    %c0_i32_8 = arith.constant 0 : i32
    %41 = vector.broadcast %c0_i32_8 : i32 to vector<1x8xi32>
    %42 = arith.cmpi slt, %30, %41 : vector<1x8xi32>
    %c2147483647_i32_9 = arith.constant 2147483647 : i32
    %43 = vector.broadcast %c2147483647_i32_9 : i32 to vector<1x8xi32>
    %44 = arith.xori %30, %43 : vector<1x8xi32>
    %45 = arith.select %42, %44, %30 : vector<1x8xi1>, vector<1x8xi32>
    %46 = tpu.bitcast %45 : vector<1x8xi32> -> vector<1x8xf32>
    %cst_10 = arith.constant dense<-2147483648> : vector<8xi32>
    %47 = vector.multi_reduction <maxsi>, %40, %cst_10 [0] : vector<16x8xi32> to vector<8xi32>
    %48 = vector.shape_cast %47 : vector<8xi32> to vector<1x8xi32>
    %49 = vector.broadcast %48 : vector<1x8xi32> to vector<16x8xi32>
    %50 = arith.cmpi eq, %40, %49 : vector<16x8xi32>
    %c-1_i32_11 = arith.constant -1 : i32
    %51 = vector.broadcast %c-1_i32_11 : i32 to vector<16x8xi32>
    %52 = arith.select %50, %10, %51 : vector<16x8xi1>, vector<16x8xi32>
    %cst_12 = arith.constant dense<-2147483648> : vector<8xi32>
    %53 = vector.multi_reduction <maxsi>, %52, %cst_12 [0] : vector<16x8xi32> to vector<8xi32>
    %54 = vector.shape_cast %53 : vector<8xi32> to vector<1x8xi32>
    %c0_i32_13 = arith.constant 0 : i32
    %55 = vector.broadcast %c0_i32_13 : i32 to vector<1x8xi32>
    %56 = arith.cmpi slt, %48, %55 : vector<1x8xi32>
    %c2147483647_i32_14 = arith.constant 2147483647 : i32
    %57 = vector.broadcast %c2147483647_i32_14 : i32 to vector<1x8xi32>
    %58 = arith.xori %48, %57 : vector<1x8xi32>
    %59 = arith.select %56, %58, %48 : vector<1x8xi1>, vector<1x8xi32>
    %60 = tpu.bitcast %59 : vector<1x8xi32> -> vector<1x8xf32>
    %61 = arith.cmpi slt, %18, %36 : vector<1x8xi32>
    %62 = arith.select %61, %36, %18 : vector<1x8xi1>, vector<1x8xi32>
    %63 = arith.select %61, %18, %36 : vector<1x8xi1>, vector<1x8xi32>
    %64 = arith.select %61, %46, %28 : vector<1x8xi1>, vector<1x8xf32>
    %65 = arith.select %61, %28, %46 : vector<1x8xi1>, vector<1x8xf32>
    %66 = arith.cmpi slt, %63, %54 : vector<1x8xi32>
    %67 = arith.select %66, %54, %63 : vector<1x8xi1>, vector<1x8xi32>
    %68 = arith.select %66, %60, %65 : vector<1x8xi1>, vector<1x8xf32>
    %69 = arith.select %66, %65, %60 : vector<1x8xi1>, vector<1x8xf32>
    %70 = arith.cmpi slt, %62, %67 : vector<1x8xi32>
    %71 = arith.select %70, %68, %64 : vector<1x8xi1>, vector<1x8xf32>
    %72 = arith.select %70, %64, %68 : vector<1x8xi1>, vector<1x8xf32>
    %c0_15 = arith.constant 0 : index
    %c0_16 = arith.constant 0 : index
    %73 = vector.load %arg2[%c0_15, %c0_16] : memref<3x8xf32, #tpu.memory_space<vmem>>, vector<1x8xf32>
    tpu.vector_store %arg2[%c0_15, %c0_16], %71 {strides = array<i32>} : memref<3x8xf32, #tpu.memory_space<vmem>>, vector<1x8xf32>,
    %c1 = arith.constant 1 : index
    %c0_17 = arith.constant 0 : index
    %74 = vector.load %arg2[%c1, %c0_17] : memref<3x8xf32, #tpu.memory_space<vmem>>, vector<1x8xf32>
    tpu.vector_store %arg2[%c1, %c0_17], %72 {strides = array<i32>} : memref<3x8xf32, #tpu.memory_space<vmem>>, vector<1x8xf32>,
    %c2 = arith.constant 2 : index
    %c0_18 = arith.constant 0 : index
    %75 = vector.load %arg2[%c2, %c0_18] : memref<3x8xf32, #tpu.memory_space<vmem>>, vector<1x8xf32>
    tpu.vector_store %arg2[%c2, %c0_18], %69 {strides = array<i32>} : memref<3x8xf32, #tpu.memory_space<vmem>>, vector<1x8xf32>,
    return
  }
  func.func @transform_0(%arg0: i32) -> (i32, i32) {
    %c0_i32 = arith.constant 0 : i32
    %c0_i32_0 = arith.constant 0 : i32
    return %arg0, %c0_i32 : i32, i32
  }
  func.func @transform_1(%arg0: i32) -> (i32, i32) {
    %c0_i32 = arith.constant 0 : i32
    %c0_i32_0 = arith.constant 0 : i32
    return %c0_i32, %arg0 : i32, i32
  }
}

</mosaic_0001>

<bundles_post_ra>
// kernel: tpu_custom_call.1
= control target key start
LH: loop header
LB: loop body
LE: loop exit
PB: predicated region body
PF: predicated region fallthrough
CT: control target
= control target key end

     0   :  { %6 = vsyncpa [#allocation3], 0  ;;  %s315_s0 = inlined_call_operand.hbm [shape: f32[8,16], index: 0, kind: input, shape index: {}]   ;;  %s316_s1 = inlined_call_operand.hbm [shape: f32[3,8], index: 1, kind: output, shape index: {}]  }
   0x1   :  { %7 = vsyncpa [#allocation4], 0  ;;  %s256_s6 = smov [#allocation2]  }
   0x2   :  { %s14_s7 = sshll.u32 %s256_s6, 4  ;;  %s15_s7 = int_to_ptr.vmem [resolvable:$true] %s14_s7 }
   0x3   :  { %s220_s8 = scalar_lea.vmem %s15_s7, 128  ;;  %p225_p1 = scmp.lt.s32.totalorder %s15_s7, %s15_s7 }
   0x4   :  { %p221_p0 = scmp.ne.s32.totalorder %s15_s7, %s220_s8  ;;  %p226_p2 = scmp.lt.s32.totalorder %s220_s8, %s220_s8 }
   0x6   :  { %p227_p3 = por %p226_p2, %p225_p1 }
   0x8   :  { %p228_p4 = pnand %p227_p3, %p221_p0 }
   0xa   :  { %231 = shalt.err (!%p228_p4)
}
   0xb   :  { %17 = dma.hbm_to_vmem [thread:$0]  %s315_s0, 128, %s15_s7, [#allocation3]  }
   0xc   :  { %252 = dma.done.wait [#allocation3], 128  }
   0xd   :  { %253 = vsyncadd [#allocation3], 4294967168  ;;  %v21_v0 = vld [vmem:[#allocation2] sm:$0xff]  ;;  %vm67_vm1 = vcmask 64512   ;;  %v62_v8 = vlaneseq  ;;  %s257_s0 = smov [#allocation5]  }
   0xe   :  { %22 = vxpose.xlu0.b32.start.end [1/1] (short) (narrow) %v21_v0, 16  ;;  %s200_s11 = sshll.u32 %s257_s0, 4  ;;  %s201_s11 = int_to_ptr.vmem [resolvable:$true] %s200_s11 }
   0xf   :  { %v63_v12 = vshrl.u32 %v62_v8, 7  ;;  %s232_s12 = scalar_lea.vmem %s201_s11, 64  ;;  %p237_p6 = scmp.lt.s32.totalorder %s201_s11, %s201_s11 }
  0x10   :  { %p233_p5 = scmp.ne.s32.totalorder %s201_s11, %s232_s12  ;;  %p238_p7 = scmp.lt.s32.totalorder %s232_s12, %s232_s12 }
  0x11   :  { %v64_v15 = vadd.s32 8, %v63_v12  ;;  %v273_v18 = vsub.s32 15, %v63_v12 }
  0x12   :  { %p239_p8 = por %p238_p7, %p237_p6 }
  0x13   :  { %v275_v19 = vsub.s32 15, %v64_v15 }
  0x14   :  { %p240_p9 = pnand %p239_p8, %p233_p5 }
  0x8a   :  { %v38_v1 = vpop.trf.xlu0 }
  0x8b   :  { %v58_v2 = vxor.u32 2147483647, %v38_v1  ;;  %vm56_vm0 = vcmp.lt.s32.totalorder %v38_v1, 0 }
  0x8d   :  { %v60_v4 = vsel %vm56_vm0, %v58_v2, %v38_v1 }
  0x8e   :  { %v39_v3 = vpop.trf.xlu0  ;;  %v68_v7 = vsel %vm67_vm1, %v60_v4, 2147483648 }
  0x8f   :  { %vm57_vm2 = vcmp.lt.s32.totalorder %v39_v3, 0  ;;  %v59_v5 = vxor.u32 2147483647, %v39_v3 }
  0x91   :  { %v61_v6 = vsel %vm57_vm2, %v59_v5, %v39_v3 }
  0x92   :  { %v69_v9 = vsel %vm67_vm1, %v61_v6, 2147483648 }
  0x93   :  { %vm70_vm3 = vcmp.gt.s32.totalorder %v68_v7, %v69_v9 }
  0x94   :  { %v71_v10 = vsel %vm70_vm3, %v68_v7, %v69_v9 }
  0x95   :  { %v72_v11 = vrot.slane %v71_v10, 4 }
  0x97   :  { %vm73_vm4 = vcmp.gt.s32.totalorder %v71_v10, %v72_v11 }
  0x98   :  { %v74_v13 = vsel %vm73_vm4, %v71_v10, %v72_v11 }
  0x99   :  { %v75_v14 = vrot.slane %v74_v13, 2 }
  0x9b   :  { %vm76_vm5 = vcmp.gt.s32.totalorder %v74_v13, %v75_v14 }
  0x9c   :  { %v77_v16 = vsel %vm76_vm5, %v74_v13, %v75_v14 }
  0x9d   :  { %v78_v17 = vrot.slane %v77_v16, 1 }
  0x9f   :  { %vm79_vm6 = vcmp.gt.s32.totalorder %v77_v16, %v78_v17 }
  0xa0   :  { %v80_v20 = vsel %vm79_vm6, %v77_v16, %v78_v17 }
  0xa1   :  { %vm81_vm7 = vcmp.eq.s32.totalorder %v60_v4, %v80_v20  ;;  %vm82_vm8 = vcmp.eq.s32.totalorder %v61_v6, %v80_v20  ;;  %v103_v53 = vxor.u32 2147483647, %v80_v20 }
  0xa2   :  { %v83_v21 = vsel %vm81_vm7, %v273_v18, 4294967295  ;;  %v84_v22 = vsel %vm82_vm8, %v275_v19, 4294967295 }
  0xa3   :  { %v85_v23 = vsel %vm67_vm1, %v83_v21, 2147483648  ;;  %v86_v24 = vsel %vm67_vm1, %v84_v22, 2147483648 }
  0xa4   :  { %vm87_vm9 = vcmp.gt.s32.totalorder %v85_v23, %v86_v24 }
  0xa5   :  { %v88_v25 = vsel %vm87_vm9, %v85_v23, %v86_v24 }
  0xa6   :  { %v89_v26 = vrot.slane %v88_v25, 4 }
  0xa8   :  { %vm90_vm10 = vcmp.gt.s32.totalorder %v88_v25, %v89_v26 }
  0xa9   :  { %v91_v27 = vsel %vm90_vm10, %v88_v25, %v89_v26  ;;  %vm102_vm10 = vcmp.lt.s32.totalorder %v80_v20, 0 }
  0xaa   :  { %v92_v28 = vrot.slane %v91_v27, 2  ;;  %v104_v58 = vsel %vm102_vm10, %v103_v53, %v80_v20 }
  0xac   :  { %vm93_vm11 = vcmp.gt.s32.totalorder %v91_v27, %v92_v28 }
  0xad   :  { %v94_v29 = vsel %vm93_vm11, %v91_v27, %v92_v28 }
  0xae   :  { %v95_v30 = vrot.slane %v94_v29, 1 }
  0xb0   :  { %vm96_vm12 = vcmp.gt.s32.totalorder %v94_v29, %v95_v30 }
  0xb1   :  { %v281_v31 = vsel %vm96_vm12, %v94_v29, %v95_v30 }
  0xb2   :  { %vm98_vm13 = vcmp.eq.s32.totalorder %v273_v18, %v281_v31  ;;  %vm99_vm14 = vcmp.eq.s32.totalorder %v275_v19, %v281_v31 }
  0xb3   :  { %v100_v32 = vsel %vm98_vm13, 2147483648, %v60_v4  ;;  %v101_v33 = vsel %vm99_vm14, 2147483648, %v61_v6 }
  0xb4   :  { %v106_v34 = vsel %vm67_vm1, %v100_v32, 2147483648  ;;  %v107_v35 = vsel %vm67_vm1, %v101_v33, 2147483648 }
  0xb5   :  { %vm108_vm15 = vcmp.gt.s32.totalorder %v106_v34, %v107_v35 }
  0xb6   :  { %v109_v36 = vsel %vm108_vm15, %v106_v34, %v107_v35 }
  0xb7   :  { %v110_v37 = vrot.slane %v109_v36, 4 }
  0xb9   :  { %vm111_vm0 = vcmp.gt.s32.totalorder %v109_v36, %v110_v37 }
  0xba   :  { %v112_v38 = vsel %vm111_vm0, %v109_v36, %v110_v37 }
  0xbb   :  { %v113_v39 = vrot.slane %v112_v38, 2 }
  0xbd   :  { %vm114_vm2 = vcmp.gt.s32.totalorder %v112_v38, %v113_v39 }
  0xbe   :  { %v115_v40 = vsel %vm114_vm2, %v112_v38, %v113_v39 }
  0xbf   :  { %v116_v41 = vrot.slane %v115_v40, 1 }
  0xc1   :  { %vm117_vm3 = vcmp.gt.s32.totalorder %v115_v40, %v116_v41 }
  0xc2   :  { %v118_v42 = vsel %vm117_vm3, %v115_v40, %v116_v41 }
  0xc3   :  { %vm119_vm4 = vcmp.eq.s32.totalorder %v100_v32, %v118_v42  ;;  %vm120_vm5 = vcmp.eq.s32.totalorder %v101_v33, %v118_v42  ;;  %v141_v54 = vxor.u32 2147483647, %v118_v42  ;;  %vm140_vm11 = vcmp.lt.s32.totalorder %v118_v42, 0 }
  0xc4   :  { %v121_v43 = vsel %vm119_vm4, %v273_v18, 4294967295  ;;  %v122_v44 = vsel %vm120_vm5, %v275_v19, 4294967295 }
  0xc5   :  { %v123_v45 = vsel %vm67_vm1, %v121_v43, 2147483648  ;;  %v124_v46 = vsel %vm67_vm1, %v122_v44, 2147483648  ;;  %v142_v59 = vsel %vm140_vm11, %v141_v54, %v118_v42  ;;  %vm190_vm11 = vcmask 57344  }
  0xc6   :  { %vm125_vm6 = vcmp.gt.s32.totalorder %v123_v45, %v124_v46 }
  0xc7   :  { %v126_v47 = vsel %vm125_vm6, %v123_v45, %v124_v46 }
  0xc8   :  { %v127_v48 = vrot.slane %v126_v47, 4 }
  0xca   :  { %vm128_vm7 = vcmp.gt.s32.totalorder %v126_v47, %v127_v48 }
  0xcb   :  { %v129_v49 = vsel %vm128_vm7, %v126_v47, %v127_v48 }
  0xcc   :  { %v130_v50 = vrot.slane %v129_v49, 2 }
  0xce   :  { %vm131_vm8 = vcmp.gt.s32.totalorder %v129_v49, %v130_v50 }
  0xcf   :  { %v132_v51 = vsel %vm131_vm8, %v129_v49, %v130_v50 }
  0xd0   :  { %v133_v52 = vrot.slane %v132_v51, 1 }
  0xd2   :  { %vm134_vm9 = vcmp.gt.s32.totalorder %v132_v51, %v133_v52 }
  0xd3   :  { %v135_v55 = vsel %vm134_vm9, %v132_v51, %v133_v52 }
  0xd4   :  { %vm136_vm12 = vcmp.eq.s32.totalorder %v273_v18, %v135_v55  ;;  %vm137_vm13 = vcmp.eq.s32.totalorder %v275_v19, %v135_v55  ;;  %vm178_vm14 = vcmp.lt.s32.totalorder %v281_v31, %v135_v55 }
  0xd5   :  { %v138_v56 = vsel %vm136_vm12, 2147483648, %v100_v32  ;;  %v139_v57 = vsel %vm137_vm13, 2147483648, %v101_v33  ;;  %v181_v62 = vsel %vm178_vm14, %v142_v59, %v104_v58  ;;  %v182_v63 = vsel %vm178_vm14, %v104_v58, %v142_v59 }
  0xd6   :  { %v144_v60 = vsel %vm67_vm1, %v138_v56, 2147483648  ;;  %v145_v61 = vsel %vm67_vm1, %v139_v57, 2147483648  ;;  %v179_v21 = vsel %vm178_vm14, %v135_v55, %v281_v31 }
  0xd7   :  { %vm146_vm15 = vcmp.gt.s32.totalorder %v144_v60, %v145_v61 }
  0xd8   :  { %v147_v0 = vsel %vm146_vm15, %v144_v60, %v145_v61 }
  0xd9   :  { %v148_v1 = vrot.slane %v147_v0, 4 }
  0xdb   :  { %vm149_vm0 = vcmp.gt.s32.totalorder %v147_v0, %v148_v1 }
  0xdc   :  { %v150_v2 = vsel %vm149_vm0, %v147_v0, %v148_v1 }
  0xdd   :  { %v151_v3 = vrot.slane %v150_v2, 2 }
  0xdf   :  { %vm152_vm2 = vcmp.gt.s32.totalorder %v150_v2, %v151_v3 }
  0xe0   :  { %v153_v4 = vsel %vm152_vm2, %v150_v2, %v151_v3 }
  0xe1   :  { %v154_v5 = vrot.slane %v153_v4, 1 }
  0xe3   :  { %vm155_vm3 = vcmp.gt.s32.totalorder %v153_v4, %v154_v5 }
  0xe4   :  { %v156_v6 = vsel %vm155_vm3, %v153_v4, %v154_v5 }
  0xe5   :  { %vm157_vm4 = vcmp.eq.s32.totalorder %v138_v56, %v156_v6  ;;  %vm158_vm5 = vcmp.eq.s32.totalorder %v139_v57, %v156_v6  ;;  %v175_v17 = vxor.u32 2147483647, %v156_v6  ;;  %vm174_vm9 = vcmp.lt.s32.totalorder %v156_v6, 0 }
  0xe6   :  { %v159_v7 = vsel %vm157_vm4, %v273_v18, 4294967295  ;;  %v160_v8 = vsel %vm158_vm5, %v275_v19, 4294967295  ;;  %v180_v18 = vsel %vm178_vm14, %v281_v31, %v135_v55 }
  0xe7   :  { %v161_v9 = vsel %vm67_vm1, %v159_v7, 2147483648  ;;  %v162_v10 = vsel %vm67_vm1, %v160_v8, 2147483648  ;;  %v176_v19 = vsel %vm174_vm9, %v175_v17, %v156_v6 }
  0xe8   :  { %vm163_vm6 = vcmp.gt.s32.totalorder %v161_v9, %v162_v10 }
  0xe9   :  { %v164_v11 = vsel %vm163_vm6, %v161_v9, %v162_v10 }
  0xea   :  { %v165_v12 = vrot.slane %v164_v11, 4 }
  0xec   :  { %vm166_vm7 = vcmp.gt.s32.totalorder %v164_v11, %v165_v12 }
  0xed   :  { %v167_v13 = vsel %vm166_vm7, %v164_v11, %v165_v12 }
  0xee   :  { %v168_v14 = vrot.slane %v167_v13, 2 }
  0xf0   :  { %vm169_vm8 = vcmp.gt.s32.totalorder %v167_v13, %v168_v14 }
  0xf1   :  { %v170_v15 = vsel %vm169_vm8, %v167_v13, %v168_v14 }
  0xf2   :  { %v171_v16 = vrot.slane %v170_v15, 1 }
  0xf4   :  { %vm172_vm10 = vcmp.gt.s32.totalorder %v170_v15, %v171_v16 }
  0xf5   :  { %v173_v20 = vsel %vm172_vm10, %v170_v15, %v171_v16 }
  0xf6   :  { %vm183_vm1 = vcmp.lt.s32.totalorder %v180_v18, %v173_v20 }
  0xf7   :  { %v184_v22 = vsel %vm183_vm1, %v173_v20, %v180_v18  ;;  %v185_v23 = vsel %vm183_vm1, %v176_v19, %v182_v63  ;;  %v186_v24 = vsel %vm183_vm1, %v182_v63, %v176_v19 }
  0xf8   :  { %vm187_vm12 = vcmp.lt.s32.totalorder %v179_v21, %v184_v22  ;;  %193 = vst.msk [vmem:[#allocation5 + $0x2] sm:$0x1] %vm190_vm11, %v186_v24 }
  0xf9   :  { %v188_v25 = vsel %vm187_vm12, %v185_v23, %v181_v62  ;;  %v189_v26 = vsel %vm187_vm12, %v181_v62, %v185_v23 }
  0xfa   :  { %191 = vst.msk [vmem:[#allocation5] sm:$0x1] %vm190_vm11, %v188_v25  ;;  %192 = vst.msk [vmem:[#allocation5 + $0x1] sm:$0x1] %vm190_vm11, %v189_v26 }
  0xfb   :  { %243 = shalt.err (!%p240_p9)
}
  0xfc   :  { %203 = dma.vmem_to_hbm [thread:$0]  %s201_s11, 64, %s316_s1, [#allocation4]  }
  0xfd   :  { %254 = dma.done.wait [#allocation4], 64  }
  0xfe   :  { %255 = vsyncadd [#allocation4], 4294967232 }
  0xff   :  { %207 = vsyncpa [#allocation3], 1 }
 0x100   :  { %208 = vsyncpa [#allocation4], 1 }

</bundles_post_ra>
